<compile_context>
chip_gen: v7x
topology: tpu7x:2x2x1
jax: 0.10.0
libtpu: 0.0.40
codegen_flags: <defaults>
</compile_context>

<pallas_src>
import functools

import jax
import jax.numpy as jnp
from jax.experimental import pallas as pl
from jax.experimental.pallas import tpu as pltpu


def _round_up(x, m):
    return ((x + m - 1) // m) * m


def _tiles_for(n, block_m=None, block_k=None):
    """Pick (tm, tk, n_pad). n_pad is a multiple of 128 (lane-full adj tiles)."""
    n_pad = _round_up(max(n, 128), 128)

    if block_m is None:
        # Row tile: as large as reasonable, but keep >= 2 row tiles when
        # possible so the "parallel" axis can feed both v7x TensorCores.
        tm = 128
        for cand in (512, 256, 128):
            if n_pad % cand == 0 and n_pad // cand >= 2:
                tm = cand
                break
    else:
        tm = block_m

    if block_k is None:
        # Reduction (adj-column) tile: one k tile when it fits, otherwise the
        # largest lane-aligned divisor <= 2048 (per-grid-step overhead ~0.35us,
        # so large tiles keep the dominant adj stream near the HBM roofline).
        if n_pad <= 2048:
            tk = n_pad
        else:
            tk = 128
            cand = 2048
            while cand >= 128:
                if n_pad % cand == 0:
                    tk = cand
                    break
                cand -= 128
    else:
        tk = block_k

    if n_pad % tm or n_pad % tk:
        raise ValueError(f"block sizes ({tm}, {tk}) must divide padded N={n_pad}")
    return tm, tk, n_pad


def prepare_adjacency(adj, n=None):
    """One-time adjacency prep, hoisted out of the per-call jitted path.

    The adjacency is a module constant (set in __init__), so cast it to bf16
    (exact for 0/1 entries) and pad it to the kernel's tile multiple ONCE,
    instead of re-reading/re-writing the dominant N^2 array every forward.
    NOTE: assumes a {0,1} adjacency; weighted adjacencies should stay f32.
    """
    if n is None:
        n = adj.shape[0]
    _, _, n_pad = _tiles_for(n)
    adj_b = jnp.asarray(adj).astype(jnp.bfloat16)
    pad = n_pad - n
    if pad:
        adj_b = jnp.pad(adj_b, ((0, pad), (0, pad)))
    return adj_b


def _graph_layer_kernel(semb_ref, adj_ref, cemb_ref, nemb_ref, mask_ref,
                        w_ref, b_ref, co_ref, no_ref, acc_ref):
    """Grid = (row_tiles, k_tiles); k (reduction over adj columns) innermost."""
    k = pl.program_id(1)

    @pl.when(k == 0)
    def _init():
        acc_ref[...] = jnp.zeros_like(acc_ref)

    # Fused aggregation: agg += adj_tile @ (cx*cemb + nx*nemb)_tile.
    # Both operands arrive as bf16 -> native bf16 MXU matmul, f32 accumulate
    # (no (tm,tk) f32 upcast temp, no multi-pass f32 MXU mode).
    acc_ref[...] += jnp.dot(adj_ref[...], semb_ref[...],
                            preferred_element_type=jnp.float32)

    @pl.when(k == pl.num_programs(1) - 1)
    def _finalize():
        agg = acc_ref[...]                       # (TM, C) f32
        cx = mask_ref[:, 0:1]                    # (TM, 1)
        nx = mask_ref[:, 1:2]                    # (TM, 1)

        # co_in = cx*cemb + cx*agg = cx*(cemb + agg); likewise for no_in.
        co_in = cx * (cemb_ref[...] + agg)       # (TM, C) f32
        no_in = nx * (nemb_ref[...] + agg)       # (TM, C) f32

        w = w_ref[...]                           # (C, Gp) f32, resident
        b = b_ref[...]                           # (1, Gp) f32, resident

        # Two direct dots straight into the (lane-dense, Gp>=128) outputs:
        # no concat/split temps, unmasked full-width stores.
        co = jnp.dot(co_in, w, preferred_element_type=jnp.float32) + b
        no = jnp.dot(no_in, w, preferred_element_type=jnp.float32) + b
        co_ref[...] = jnp.where(co > 0, co, jnp.float32(0.01) * co)   # LeakyReLU
        no_ref[...] = jnp.where(no > 0, no, jnp.float32(0.01) * no)


@functools.partial(jax.jit, static_argnames=("block_m", "block_k"))
def graph_layer(code_x, neighbor, c_embeddings, n_embeddings, adj_prepared,
                weight, bias, *, block_m=None, block_k=None):
    """
    code_x, neighbor : (N,)   multi-hot node indicators
    c/n_embeddings   : (N, C) float32
    adj_prepared     : output of prepare_adjacency(adj)  -- (n_pad, n_pad) bf16
                       (a raw (N, N) adjacency is also accepted: slow path)
    weight           : (G, C) float32   (PyTorch nn.Linear layout)
    bias             : (G,)   float32
    returns (co, no) : each (N, G) float32
    """
    N, C = c_embeddings.shape
    G = weight.shape[0]
    tm, tk, n_pad = _tiles_for(N, block_m, block_k)

    if adj_prepared.shape == (n_pad, n_pad) and adj_prepared.dtype == jnp.bfloat16:
        adj_b = adj_prepared
    elif adj_prepared.shape == (N, N):
        # Fallback (slow path): caller did not hoist the adjacency prep.
        # Prefer prepare_adjacency() once at module setup -- doing it here
        # re-streams the dominant N^2 array through extra HBM traffic per call.
        adj_b = adj_prepared.astype(jnp.bfloat16)
        if n_pad != N:
            adj_b = jnp.pad(adj_b, ((0, n_pad - N), (0, n_pad - N)))
    else:
        raise ValueError(
            f"adjacency shape {adj_prepared.shape} matches neither the prepared "
            f"({n_pad},{n_pad}) nor the raw ({N},{N}) layout")

    # ---- per-call prep (small, fuses under jit) ---------------------------
    cx = code_x.astype(jnp.float32).reshape(N, 1)
    nx = neighbor.astype(jnp.float32).reshape(N, 1)
    mask = jnp.concatenate([cx, nx], axis=1)                 # (N, 2) packed mask
    cemb = c_embeddings.astype(jnp.float32)
    nemb = n_embeddings.astype(jnp.float32)
    # Shared aggregation input, streamed as bf16 so the MXU runs native bf16
    # (adjacency is exact 0/1 in bf16; only this operand is bf16-rounded).
    # The dense projection in the finalize stays f32.
    semb = (cx * cemb + nx * nemb).astype(jnp.bfloat16)

    pad_n = n_pad - N
    if pad_n:
        mask = jnp.pad(mask, ((0, pad_n), (0, 0)))
        cemb = jnp.pad(cemb, ((0, pad_n), (0, 0)))
        nemb = jnp.pad(nemb, ((0, pad_n), (0, 0)))
        semb = jnp.pad(semb, ((0, pad_n), (0, 0)))

    # Pad the output feature dim to a full 128-lane width (unmasked stores);
    # the extra columns are zero weight/bias and are sliced away afterwards.
    Gp = _round_up(G, 128)
    w_t = weight.T.astype(jnp.float32)                       # (C, G)
    b2 = bias.astype(jnp.float32).reshape(1, G)
    if Gp != G:
        w_t = jnp.pad(w_t, ((0, 0), (0, Gp - G)))
        b2 = jnp.pad(b2, ((0, 0), (0, Gp - G)))

    ni, nk = n_pad // tm, n_pad // tk

    # ---- VMEM budget (double-buffered streams + resident tiles) -----------
    vmem_bytes = (
        2 * tm * tk * 2              # adj tiles (bf16)
        + 2 * tk * C * 2             # semb tiles (bf16)
        + 2 * 2 * tm * C * 4         # cemb + nemb row tiles
        + 2 * tm * 2 * 4             # packed [cx, nx] mask
        + 2 * (C * Gp * 4 + Gp * 4)  # W.T + bias (resident)
        + 2 * 2 * tm * Gp * 4        # co + no output tiles
        + tm * C * 4                 # f32 accumulator scratch
    )
    # Tight, computed limit (headroom for compiler scratch), capped at the
    # 32 MiB scoped default so it stays comfortable on v7x's 64 MiB VMEM.
    vmem_limit = int(min(max(2 * vmem_bytes, 16 << 20), 32 << 20))

    grid_spec = pltpu.PrefetchScalarGridSpec(
        num_scalar_prefetch=0,
        grid=(ni, nk),                                       # reduction axis last
        in_specs=[
            pl.BlockSpec((tk, C), lambda i, k: (k, 0)),      # semb  (bf16, k-streamed)
            # If profiling shows exposed DMA on the adjacency stream, sweep
            # pipeline_mode=pl.Buffered(3) on this spec (cheap extra VMEM).
            pl.BlockSpec((tm, tk), lambda i, k: (i, k)),     # adj   (bf16 tile)
            pl.BlockSpec((tm, C), lambda i, k: (i, 0)),      # cemb  (row-resident)
            pl.BlockSpec((tm, C), lambda i, k: (i, 0)),      # nemb  (row-resident)
            pl.BlockSpec((tm, 2), lambda i, k: (i, 0)),      # [cx, nx] packed mask
            pl.BlockSpec((C, Gp), lambda i, k: (0, 0)),      # W.T   (resident)
            pl.BlockSpec((1, Gp), lambda i, k: (0, 0)),      # bias  (resident)
        ],
        out_specs=(
            pl.BlockSpec((tm, Gp), lambda i, k: (i, 0)),     # co (written at last k)
            pl.BlockSpec((tm, Gp), lambda i, k: (i, 0)),     # no
        ),
        scratch_shapes=[pltpu.VMEM((tm, C), jnp.float32)],   # agg accumulator
    )

    co_p, no_p = pl.pallas_call(
        _graph_layer_kernel,
        out_shape=(jax.ShapeDtypeStruct((n_pad, Gp), jnp.float32),
                   jax.ShapeDtypeStruct((n_pad, Gp), jnp.float32)),
        grid_spec=grid_spec,
        compiler_params=pltpu.CompilerParams(
            dimension_semantics=("parallel", "arbitrary"),
            vmem_limit_bytes=vmem_limit,
        ),
    )(semb, adj_b, cemb, nemb, mask, w_t, b2)

    return co_p[:N, :G], no_p[:N, :G]


def _reference(code_x, neighbor, c_emb, n_emb, adj, weight, bias):
    hp = jax.lax.Precision.HIGHEST
    cx = code_x.astype(jnp.float32)[:, None]
    nx = neighbor.astype(jnp.float32)[:, None]
    cemb = cx * c_emb
    nemb = nx * n_emb
    cc = cx * jnp.matmul(adj, cemb, precision=hp)
    cn = cx * jnp.matmul(adj, nemb, precision=hp)
    nn_ = nx * jnp.matmul(adj, nemb, precision=hp)
    nc = nx * jnp.matmul(adj, cemb, precision=hp)
    dense = lambda x: jnp.matmul(x, weight.T, precision=hp) + bias
    lrelu = lambda x: jnp.where(x > 0, x, 0.01 * x)
    return lrelu(dense(cemb + cc + cn)), lrelu(dense(nemb + nn_ + nc))


if __name__ == "__main__":
    def run_case(key, N, C, G, block_k=None):
        k = jax.random.split(key, 7)
        code_x = (jax.random.uniform(k[0], (N,)) > 0.5).astype(jnp.float32)
        neighbor = (jax.random.uniform(k[1], (N,)) > 0.5).astype(jnp.float32)
        c_embeddings = jax.random.normal(k[2], (N, C), dtype=jnp.float32)
        n_embeddings = jax.random.normal(k[3], (N, C), dtype=jnp.float32)
        adj = (jax.random.uniform(k[4], (N, N)) > 0.7).astype(jnp.float32)
        bound = 1.0 / (C ** 0.5)
        weight = jax.random.uniform(k[5], (G, C), minval=-bound, maxval=bound,
                                    dtype=jnp.float32)
        bias = jax.random.uniform(k[6], (G,), minval=-bound, maxval=bound,
                                  dtype=jnp.float32)

        adj_prepared = prepare_adjacency(adj)        # one-time, hoisted prep
        co, no = graph_layer(code_x, neighbor, c_embeddings, n_embeddings,
                             adj_prepared, weight, bias, block_k=block_k)
        jax.block_until_ready((co, no))

        co_ref, no_ref = _reference(code_x, neighbor, c_embeddings, n_embeddings,
                                    adj, weight, bias)
        assert co.shape == (N, G) and no.shape == (N, G)
        # Tolerance covers the bf16 rounding of the aggregation operand
        # (adjacency is exact 0/1 in bf16; dense projection stays f32);
        # outputs here are O(1..10) so this is ~<=1% relative.
        assert jnp.allclose(co, co_ref, atol=5e-2, rtol=2e-2), \
            float(jnp.max(jnp.abs(co - co_ref)))
        assert jnp.allclose(no, no_ref, atol=5e-2, rtol=2e-2), \
            float(jnp.max(jnp.abs(no - no_ref)))

    key = jax.random.PRNGKey(0)
    k1, k2, k3 = jax.random.split(key, 3)
    run_case(k1, N=16, C=32, G=32)                  # tiny: lane-padded to 128, grid (1,1)
    run_case(k2, N=200, C=32, G=32)                 # pad to 256: grid (2,1), single-k fast path
    run_case(k3, N=200, C=32, G=32, block_k=128)    # forced nk=2: accumulator + pl.when finalize
    print("KERNEL_OK")
</pallas_src>

<mosaic_0001>
module attributes {stable_mosaic.version = 11 : i64} {
  func.func @_graph_layer_kernel(%arg0: i32, %arg1: i32, %arg2: memref<128x32xbf16, #tpu.memory_space<vmem>>, %arg3: memref<128x128xbf16, #tpu.memory_space<vmem>>, %arg4: memref<128x32xf32, #tpu.memory_space<vmem>>, %arg5: memref<128x32xf32, #tpu.memory_space<vmem>>, %arg6: memref<128x2xf32, #tpu.memory_space<vmem>>, %arg7: memref<32x128xf32, #tpu.memory_space<vmem>>, %arg8: memref<1x128xf32, #tpu.memory_space<vmem>>, %arg9: memref<128x128xf32, #tpu.memory_space<vmem>>, %arg10: memref<128x128xf32, #tpu.memory_space<vmem>>, %arg11: memref<128x32xf32, #tpu.memory_space<vmem>>) attributes {dimension_semantics = [#tpu.dimension_semantics<parallel>, #tpu.dimension_semantics<arbitrary>], iteration_bounds = array<i64: 1, 1>, scalar_prefetch = 0 : i64, scratch_operands = 1 : i64, tpu.core_type = #tpu.core_type<tc>, window_params = [{transform_indices = @transform_0, window_bounds = array<i64: 128, 32>}, {transform_indices = @transform_1, window_bounds = array<i64: 128, 128>}, {transform_indices = @transform_2, window_bounds = array<i64: 128, 32>}, {transform_indices = @transform_3, window_bounds = array<i64: 128, 32>}, {transform_indices = @transform_4, window_bounds = array<i64: 128, 2>}, {pipeline_mode = #tpu.pipeline_mode<synchronous>, transform_indices = @transform_5, window_bounds = array<i64: 32, 128>}, {pipeline_mode = #tpu.pipeline_mode<synchronous>, transform_indices = @transform_6, window_bounds = array<i64: 1, 128>}, {transform_indices = @transform_7, window_bounds = array<i64: 128, 128>}, {transform_indices = @transform_8, window_bounds = array<i64: 128, 128>}]} {
    %c0_i32 = arith.constant 0 : i32
    %0 = arith.cmpi eq, %arg1, %c0_i32 : i32
    %1 = arith.extui %0 : i1 to i32
    %c0_i32_0 = arith.constant 0 : i32
    %2 = arith.cmpi ne, %1, %c0_i32_0 : i32
    scf.if %2 {
      %cst_10 = arith.constant 0.000000e+00 : f32
      %12 = vector.broadcast %cst_10 : f32 to vector<128x32xf32>
      %c0_11 = arith.constant 0 : index
      %c0_12 = arith.constant 0 : index
      %13 = vector.load %arg11[%c0_11, %c0_12] : memref<128x32xf32, #tpu.memory_space<vmem>>, vector<128x32xf32>
      tpu.vector_store %arg11[%c0_11, %c0_12], %12 {strides = array<i32>} : memref<128x32xf32, #tpu.memory_space<vmem>>, vector<128x32xf32>,
    } else {
    }
    %c0 = arith.constant 0 : index
    %c0_1 = arith.constant 0 : index
    %3 = vector.load %arg11[%c0, %c0_1] : memref<128x32xf32, #tpu.memory_space<vmem>>, vector<128x32xf32>
    %c0_2 = arith.constant 0 : index
    %c0_3 = arith.constant 0 : index
    %4 = vector.load %arg3[%c0_2, %c0_3] : memref<128x128xbf16, #tpu.memory_space<vmem>>, vector<128x128xbf16>
    %c0_4 = arith.constant 0 : index
    %c0_5 = arith.constant 0 : index
    %5 = vector.load %arg2[%c0_4, %c0_5] : memref<128x32xbf16, #tpu.memory_space<vmem>>, vector<128x32xbf16>
    %cst = arith.constant dense<0.000000e+00> : vector<128x32xf32>
    %6 = tpu.matmul %4, %5, %cst {dimension_numbers = #tpu.dot_dimension_numbers<[1], [0], [0], [1], [0, 0, 1, 1], [], []>} : vector<128x128xbf16>, vector<128x32xbf16>, vector<128x32xf32> -> vector<128x32xf32>
    %7 = arith.addf %3, %6 : vector<128x32xf32>
    %c0_6 = arith.constant 0 : index
    %c0_7 = arith.constant 0 : index
    %8 = vector.load %arg11[%c0_6, %c0_7] : memref<128x32xf32, #tpu.memory_space<vmem>>, vector<128x32xf32>
    tpu.vector_store %arg11[%c0_6, %c0_7], %7 {strides = array<i32>} : memref<128x32xf32, #tpu.memory_space<vmem>>, vector<128x32xf32>,
    %c0_i32_8 = arith.constant 0 : i32
    %9 = arith.cmpi eq, %arg1, %c0_i32_8 : i32
    %10 = arith.extui %9 : i1 to i32
    %c0_i32_9 = arith.constant 0 : i32
    %11 = arith.cmpi ne, %10, %c0_i32_9 : i32
    scf.if %11 {
      %c0_10 = arith.constant 0 : index
      %c0_11 = arith.constant 0 : index
      %12 = vector.load %arg11[%c0_10, %c0_11] : memref<128x32xf32, #tpu.memory_space<vmem>>, vector<128x32xf32>
      %c0_12 = arith.constant 0 : index
      %c0_13 = arith.constant 0 : index
      %13 = vector.load %arg6[%c0_12, %c0_13] : memref<128x2xf32, #tpu.memory_space<vmem>>, vector<128x1xf32>
      %c0_14 = arith.constant 0 : index
      %c1 = arith.constant 1 : index
      %14 = vector.load %arg6[%c0_14, %c1] : memref<128x2xf32, #tpu.memory_space<vmem>>, vector<128x1xf32>
      %c0_15 = arith.constant 0 : index
      %c0_16 = arith.constant 0 : index
      %15 = vector.load %arg4[%c0_15, %c0_16] : memref<128x32xf32, #tpu.memory_space<vmem>>, vector<128x32xf32>
      %16 = arith.addf %15, %12 : vector<128x32xf32>
      %17 = vector.broadcast %13 : vector<128x1xf32> to vector<128x32xf32>
      %18 = arith.mulf %17, %16 : vector<128x32xf32>
      %c0_17 = arith.constant 0 : index
      %c0_18 = arith.constant 0 : index
      %19 = vector.load %arg5[%c0_17, %c0_18] : memref<128x32xf32, #tpu.memory_space<vmem>>, vector<128x32xf32>
      %20 = arith.addf %19, %12 : vector<128x32xf32>
      %21 = vector.broadcast %14 : vector<128x1xf32> to vector<128x32xf32>
      %22 = arith.mulf %21, %20 : vector<128x32xf32>
      %c0_19 = arith.constant 0 : index
      %c0_20 = arith.constant 0 : index
      %23 = vector.load %arg7[%c0_19, %c0_20] : memref<32x128xf32, #tpu.memory_space<vmem>>, vector<32x128xf32>
      %c0_21 = arith.constant 0 : index
      %c0_22 = arith.constant 0 : index
      %24 = vector.load %arg8[%c0_21, %c0_22] : memref<1x128xf32, #tpu.memory_space<vmem>>, vector<1x128xf32>
      %cst_23 = arith.constant dense<0.000000e+00> : vector<128x128xf32>
      %25 = tpu.matmul %18, %23, %cst_23 {dimension_numbers = #tpu.dot_dimension_numbers<[1], [0], [0], [1], [0, 0, 1, 1], [], []>} : vector<128x32xf32>, vector<32x128xf32>, vector<128x128xf32> -> vector<128x128xf32>
      %26 = vector.broadcast %24 : vector<1x128xf32> to vector<128x128xf32>
      %27 = arith.addf %25, %26 : vector<128x128xf32>
      %cst_24 = arith.constant dense<0.000000e+00> : vector<128x128xf32>
      %28 = tpu.matmul %22, %23, %cst_24 {dimension_numbers = #tpu.dot_dimension_numbers<[1], [0], [0], [1], [0, 0, 1, 1], [], []>} : vector<128x32xf32>, vector<32x128xf32>, vector<128x128xf32> -> vector<128x128xf32>
      %29 = vector.broadcast %24 : vector<1x128xf32> to vector<128x128xf32>
      %30 = arith.addf %28, %29 : vector<128x128xf32>
      %cst_25 = arith.constant 0.000000e+00 : f32
      %31 = vector.broadcast %cst_25 : f32 to vector<128x128xf32>
      %32 = arith.cmpf ogt, %27, %31 : vector<128x128xf32>
      %cst_26 = arith.constant 0.00999999977 : f32
      %33 = vector.broadcast %cst_26 : f32 to vector<128x128xf32>
      %34 = arith.mulf %33, %27 : vector<128x128xf32>
      %35 = arith.select %32, %27, %34 : vector<128x128xi1>, vector<128x128xf32>
      %c0_27 = arith.constant 0 : index
      %c0_28 = arith.constant 0 : index
      %36 = vector.load %arg9[%c0_27, %c0_28] : memref<128x128xf32, #tpu.memory_space<vmem>>, vector<128x128xf32>
      tpu.vector_store %arg9[%c0_27, %c0_28], %35 {strides = array<i32>} : memref<128x128xf32, #tpu.memory_space<vmem>>, vector<128x128xf32>,
      %cst_29 = arith.constant 0.000000e+00 : f32
      %37 = vector.broadcast %cst_29 : f32 to vector<128x128xf32>
      %38 = arith.cmpf ogt, %30, %37 : vector<128x128xf32>
      %cst_30 = arith.constant 0.00999999977 : f32
      %39 = vector.broadcast %cst_30 : f32 to vector<128x128xf32>
      %40 = arith.mulf %39, %30 : vector<128x128xf32>
      %41 = arith.select %38, %30, %40 : vector<128x128xi1>, vector<128x128xf32>
      %c0_31 = arith.constant 0 : index
      %c0_32 = arith.constant 0 : index
      %42 = vector.load %arg10[%c0_31, %c0_32] : memref<128x128xf32, #tpu.memory_space<vmem>>, vector<128x128xf32>
      tpu.vector_store %arg10[%c0_31, %c0_32], %41 {strides = array<i32>} : memref<128x128xf32, #tpu.memory_space<vmem>>, vector<128x128xf32>,
    } else {
    }
    return
  }
  func.func @transform_0(%arg0: i32, %arg1: i32) -> (i32, i32) {
    %c0_i32 = arith.constant 0 : i32
    %c0_i32_0 = arith.constant 0 : i32
    return %arg1, %c0_i32 : i32, i32
  }
  func.func @transform_1(%arg0: i32, %arg1: i32) -> (i32, i32) {
    %c0_i32 = arith.constant 0 : i32
    return %arg0, %arg1 : i32, i32
  }
  func.func @transform_2(%arg0: i32, %arg1: i32) -> (i32, i32) {
    %c0_i32 = arith.constant 0 : i32
    %c0_i32_0 = arith.constant 0 : i32
    return %arg0, %c0_i32 : i32, i32
  }
  func.func @transform_3(%arg0: i32, %arg1: i32) -> (i32, i32) {
    %c0_i32 = arith.constant 0 : i32
    %c0_i32_0 = arith.constant 0 : i32
    return %arg0, %c0_i32 : i32, i32
  }
  func.func @transform_4(%arg0: i32, %arg1: i32) -> (i32, i32) {
    %c0_i32 = arith.constant 0 : i32
    %c0_i32_0 = arith.constant 0 : i32
    return %arg0, %c0_i32 : i32, i32
  }
  func.func @transform_5(%arg0: i32, %arg1: i32) -> (i32, i32) {
    %c0_i32 = arith.constant 0 : i32
    %c0_i32_0 = arith.constant 0 : i32
    %c0_i32_1 = arith.constant 0 : i32
    return %c0_i32, %c0_i32_0 : i32, i32
  }
  func.func @transform_6(%arg0: i32, %arg1: i32) -> (i32, i32) {
    %c0_i32 = arith.constant 0 : i32
    %c0_i32_0 = arith.constant 0 : i32
    %c0_i32_1 = arith.constant 0 : i32
    return %c0_i32, %c0_i32_0 : i32, i32
  }
  func.func @transform_7(%arg0: i32, %arg1: i32) -> (i32, i32) {
    %c0_i32 = arith.constant 0 : i32
    %c0_i32_0 = arith.constant 0 : i32
    return %arg0, %c0_i32 : i32, i32
  }
  func.func @transform_8(%arg0: i32, %arg1: i32) -> (i32, i32) {
    %c0_i32 = arith.constant 0 : i32
    %c0_i32_0 = arith.constant 0 : i32
    return %arg0, %c0_i32 : i32, i32
  }
}

</mosaic_0001>

<bundles_post_ra>
// kernel: graph_layer.1
= control target key start
LH: loop header
LB: loop body
LE: loop exit
PB: predicated region body
PF: predicated region fallthrough
CT: control target
= control target key end

     0   :  { %v1377_v1 = vmov 0   ;;  %v1378_v29 = vmov 1   ;;  %vm33_vm0 = vcmask 261120   ;;  %v1379_v34 = vmov 0.0   ;;  %s1973_s0 = inlined_call_operand.vmem [shape: bf16[128,32], index: 0, kind: input, shape index: {}]   ;;  %s1974_s1 = inlined_call_operand.vmem [shape: bf16[128,128], index: 1, kind: input, shape index: {}]   ;;  %s1975_s4 = inlined_call_operand.vmem [shape: f32[128,2], index: 4, kind: input, shape index: {}]   ;;  %s1976_s5 = inlined_call_operand.vmem [shape: f32[32,128], index: 5, kind: input, shape index: {}]   ;;  %s1977_s2 = inlined_call_operand.vmem [shape: f32[128,32], index: 2, kind: input, shape index: {}]   ;;  %s1978_s3 = inlined_call_operand.vmem [shape: f32[128,32], index: 3, kind: input, shape index: {}]   ;;  %s1979_s6 = inlined_call_operand.vmem [shape: f32[1,128], index: 6, kind: input, shape index: {}]   ;;  %s1980_s7 = inlined_call_operand.vmem [shape: f32[128,128], index: 7, kind: output, shape index: {0}]   ;;  %s1981_s8 = inlined_call_operand.vmem [shape: f32[128,128], index: 8, kind: output, shape index: {1}]  }
   0x1   :  { %v1361_v0 = vld [vmem:[%s1973_s0] sm:$0xff]   ;;  %1357 = vset.pattern.permute.xlu1 %v1377_v1  ;;  %1356 = vset.pattern.permute.xlu0 %v1377_v1  ;;  %v1362_v2 = vld [vmem:[%s1973_s0 + $0x8] sm:$0xff]   ;;  %v1363_v3 = vld [vmem:[%s1973_s0 + $0x10] sm:$0xff]   ;;  %36 = vst.msk [vmem:[#allocation2 + $0x10] sm:$0xff] %vm33_vm0, %v1379_v34 }
   0x2   :  { %1237 = vmatprep.subr.bf16.mxu0 %v1361_v0  ;;  %v1364_v4 = vld [vmem:[%s1973_s0 + $0x18] sm:$0xff]   ;;  %v1369_v5 = vld [vmem:[%s1974_s1] sm:$0xff]   ;;  %v1366_v7 = vld [vmem:[%s1973_s0 + $0x28] sm:$0xff]   ;;  %34 = vst.msk [vmem:[#allocation2] sm:$0xff] %vm33_vm0, %v1379_v34 }
   0x3   :  { %1238 = vmatpush3.bf16.msra.mxu0 %v1361_v0  ;;  %1253 = vmatprep.mubr.bf16.mxu0 %v1369_v5  ;;  %v1365_v6 = vld [vmem:[%s1973_s0 + $0x20] sm:$0xff]   ;;  %v348_v9 = vld [vmem:[%s1975_s4 + $0x28] sm:$0xff]  ;;  %v345_v10 = vld [vmem:[%s1975_s4 + $0x10] sm:$0xff]  ;;  %35 = vst.msk [vmem:[#allocation2 + $0x8] sm:$0xff] %vm33_vm0, %v1379_v34 }
   0x4   :  { %1239 = vmatprep.subr.bf16.mxu0 %v1362_v2  ;;  %v347_v8 = vld [vmem:[%s1975_s4 + $0x20] sm:$0xff]  ;;  %403 = vperm.xlu0 %1356, %v345_v10   ;;  %v1367_v11 = vld [vmem:[%s1973_s0 + $0x30] sm:$0xff]   ;;  %v346_v12 = vld [vmem:[%s1975_s4 + $0x18] sm:$0xff]  ;;  %37 = vst.msk [vmem:[#allocation2 + $0x18] sm:$0xff] %vm33_vm0, %v1379_v34 }
   0x5   :  { %413 = vperm.xlu1 %1357, %v347_v8   ;;  %v350_v13 = vld [vmem:[%s1975_s4 + $0x38] sm:$0xff]  ;;  %v349_v15 = vld [vmem:[%s1975_s4 + $0x30] sm:$0xff]  ;;  %v1475_v16 = vld [vmem:[%s1975_s4 + $0x48] sm:$0xff]  ;;  %38 = vst.msk [vmem:[#allocation2 + $0x20] sm:$0xff] %vm33_vm0, %v1379_v34 }
   0x6   :  { %v1368_v14 = vld [vmem:[%s1973_s0 + $0x38] sm:$0xff]   ;;  %v351_v17 = vld [vmem:[%s1975_s4 + $0x40] sm:$0xff]  ;;  %v1370_v18 = vld [vmem:[%s1974_s1 + $0x8] sm:$0xff]   ;;  %39 = vst.msk [vmem:[#allocation2 + $0x28] sm:$0xff] %vm33_vm0, %v1379_v34 }
   0x7   :  { %1240 = vmatpush3.bf16.msra.mxu0 %v1362_v2  ;;  %v354_v19 = vld [vmem:[%s1975_s4 + $0x58] sm:$0xff]  ;;  %v1371_v20 = vld [vmem:[%s1974_s1 + $0x10] sm:$0xff]   ;;  %v356_v22 = vld [vmem:[%s1975_s4 + $0x68] sm:$0xff]  ;;  %40 = vst.msk [vmem:[#allocation2 + $0x30] sm:$0xff] %vm33_vm0, %v1379_v34 }
   0x8   :  { %1241 = vmatprep.subr.bf16.mxu0 %v1363_v3  ;;  %408 = vperm.xlu0 %1356, %v346_v12   ;;  %v353_v21 = vld [vmem:[%s1975_s4 + $0x50] sm:$0xff]  ;;  %v355_v23 = vld [vmem:[%s1975_s4 + $0x60] sm:$0xff]  ;;  %v1372_v24 = vld [vmem:[%s1974_s1 + $0x18] sm:$0xff]   ;;  %41 = vst.msk [vmem:[#allocation2 + $0x38] sm:$0xff] %vm33_vm0, %v1379_v34 }
   0x9   :  { %418 = vperm.xlu1 %1357, %v348_v9   ;;  %v358_v25 = vld [vmem:[%s1975_s4 + $0x78] sm:$0xff]  ;;  %v1373_v26 = vld [vmem:[%s1974_s1 + $0x20] sm:$0xff]   ;;  %v357_v27 = vld [vmem:[%s1975_s4 + $0x70] sm:$0xff]  ;;  %42 = vst.msk [vmem:[#allocation2 + $0x40] sm:$0xff] %vm33_vm0, %v1379_v34 }
   0xa   :  { %v344_v28 = vld [vmem:[%s1975_s4 + $0x8] sm:$0xff]  ;;  %v343_v30 = vld [vmem:[%s1975_s4] sm:$0xff]  ;;  %v1375_v32 = vld [vmem:[%s1974_s1 + $0x30] sm:$0xff]   ;;  %43 = vst.msk [vmem:[#allocation2 + $0x48] sm:$0xff] %vm33_vm0, %v1379_v34 }
   0xb   :  { %1242 = vmatpush3.bf16.msra.mxu0 %v1363_v3  ;;  %v1374_v31 = vld [vmem:[%s1974_s1 + $0x28] sm:$0xff]   ;;  %v1376_v33 = vld [vmem:[%s1974_s1 + $0x38] sm:$0xff]   ;;  %44 = vst.msk [vmem:[#allocation2 + $0x50] sm:$0xff] %vm33_vm0, %v1379_v34  ;;  %45 = vst.msk [vmem:[#allocation2 + $0x58] sm:$0xff] %vm33_vm0, %v1379_v34 }
   0xc   :  { %1243 = vmatprep.subr.bf16.mxu0 %v1364_v4  ;;  %423 = vperm.xlu0 %1356, %v349_v15   ;;  %46 = vst.msk [vmem:[#allocation2 + $0x60] sm:$0xff] %vm33_vm0, %v1379_v34  ;;  %47 = vst.msk [vmem:[#allocation2 + $0x68] sm:$0xff] %vm33_vm0, %v1379_v34  ;;  %v599_v35 = vld [vmem:[%s1976_s5] sm:$0xff]  ;;  %v600_v36 = vld [vmem:[%s1976_s5 + $0x8] sm:$0xff] }
   0xd   :  { %428 = vperm.xlu1 %1357, %v350_v13   ;;  %48 = vst.msk [vmem:[#allocation2 + $0x70] sm:$0xff] %vm33_vm0, %v1379_v34  ;;  %49 = vst.msk [vmem:[#allocation2 + $0x78] sm:$0xff] %vm33_vm0, %v1379_v34  ;;  %v1550_v37 = vpack.c.bf16 %v600_v36, %v599_v35  ;;  %v601_v38 = vld [vmem:[%s1976_s5 + $0x10] sm:$0xff]  ;;  %v602_v39 = vld [vmem:[%s1976_s5 + $0x18] sm:$0xff] }
   0xe   :  { %v1562_v40 = vpack.c.bf16 %v602_v39, %v601_v38  ;;  %v52_v57 = vld [vmem:[#allocation2 + $0x10] sm:$0xff]  ;;  %v50_v58 = vld [vmem:[#allocation2] sm:$0xff]  ;;  %v53_v61 = vld [vmem:[#allocation2 + $0x18] sm:$0xff] }
   0xf   :  { %1244 = vmatpush3.bf16.msra.mxu0 %v1364_v4  ;;  %1349 = vmatprep.subr.bf16.mxu1 %v1550_v37  ;;  %v51_v0 = vld [vmem:[#allocation2 + $0x8] sm:$0xff] }
  0x10   :  { %1245 = vmatprep.subr.bf16.mxu0 %v1365_v6  ;;  %433 = vperm.xlu0 %1356, %v351_v17  }
  0x11   :  { %438 = vperm.xlu1 %1357, %v1475_v16   ;;  %1351 = vmatpush3.bf16.msra.mxu1 %v1550_v37 }
  0x12   :  { %1350 = vmatprep.subr.bf16.mxu1 %v1562_v40  ;;  %v60_v38 = vld [vmem:[#allocation2 + $0x50] sm:$0xff] }
  0x13   :  { %1246 = vmatpush3.bf16.msra.mxu0 %v1365_v6 }
  0x14   :  { %1247 = vmatprep.subr.bf16.mxu0 %v1366_v7  ;;  %443 = vperm.xlu0 %1356, %v353_v21  }
  0x15   :  { %448 = vperm.xlu1 %1357, %v354_v19   ;;  %1352 = vmatpush3.bf16.msra.mxu1 %v1562_v40 }
  0x16   :  { %1342 = vmatprep.subr.bf16.mxu1 %v1550_v37 }
  0x17   :  { %1248 = vmatpush3.bf16.msra.mxu0 %v1366_v7  ;;  %v56_v7 = vld [vmem:[#allocation2 + $0x30] sm:$0xff] }
  0x18   :  { %1249 = vmatprep.subr.bf16.mxu0 %v1367_v11  ;;  %453 = vperm.xlu0 %1356, %v355_v23  }
  0x19   :  { %458 = vperm.xlu1 %1357, %v356_v22  }
  0x1b   :  { %1250 = vmatpush3.bf16.msra.mxu0 %v1367_v11 }
  0x1c   :  { %1251 = vmatprep.subr.bf16.mxu0 %v1368_v14  ;;  %463 = vperm.xlu0 %1356, %v357_v27  }
  0x1d   :  { %468 = vperm.xlu1 %1357, %v358_v25  }
  0x1f   :  { %1252 = vmatpush3.bf16.msra.mxu0 %v1368_v14 }
  0x20   :  { %1358 = vset.pattern.permute.xlu0 %v1378_v29  ;;  %1334 = vmatprep.subr.bf16.mxu0 %v1550_v37 }
  0x21   :  { %1359 = vset.pattern.permute.xlu1 %v1378_v29  ;;  %520 = vperm.xlu0 %1358, %v343_v30  }
  0x22   :  { %1254 = vmatmul.mubr.bf16.vlgmr.msra.gmra.mrb[0].mxu0 %v1370_v18  ;;  %524 = vperm.xlu1 %1359, %v344_v28  }
  0x23   :  { %1257 = vmatprep.mubr.bf16.mxu0 %v1371_v20  ;;  %1336 = vmatpush3.bf16.msra.mxu0 %v1550_v37 }
  0x24   :  { %1338 = vmatprep.subr.bf16.mxu0 %v1562_v40 }
  0x25   :  { %532 = vperm.xlu0 %1358, %v346_v12   ;;  %v57_v12 = vld [vmem:[#allocation2 + $0x38] sm:$0xff] }
  0x26   :  { %528 = vperm.xlu1 %1359, %v345_v10  }
  0x27   :  { %1340 = vmatpush3.bf16.msra.mxu0 %v1562_v40 }
  0x29   :  { %540 = vperm.xlu0 %1358, %v348_v9   ;;  %v54_v9 = vld [vmem:[#allocation2 + $0x20] sm:$0xff] }
  0x2a   :  { %1258 = vmatmul.mubr.bf16.gmra.mrb[4].mxu0 %v1372_v24  ;;  %536 = vperm.xlu1 %1359, %v347_v8  }
  0x2b   :  { %1261 = vmatprep.mubr.bf16.mxu0 %v1373_v26 }
  0x2d   :  { %548 = vperm.xlu0 %1358, %v350_v13   ;;  %v361_v13 = vld [vmem:[%s1977_s2 + $0x10] sm:$0xff] }
  0x2e   :  { %544 = vperm.xlu1 %1359, %v349_v15  }
  0x31   :  { %556 = vperm.xlu0 %1358, %v1475_v16   ;;  %v359_v16 = vld [vmem:[%s1977_s2] sm:$0xff] }
  0x32   :  { %1262 = vmatmul.mubr.bf16.gmra.mrb[8].mxu0 %v1374_v31  ;;  %552 = vperm.xlu1 %1359, %v351_v17   ;;  %v55_v17 = vld [vmem:[#allocation2 + $0x28] sm:$0xff] }
  0x33   :  { %1265 = vmatprep.mubr.bf16.mxu0 %v1375_v32 }
  0x35   :  { %564 = vperm.xlu0 %1358, %v354_v19   ;;  %v362_v19 = vld [vmem:[%s1977_s2 + $0x18] sm:$0xff] }
  0x36   :  { %560 = vperm.xlu1 %1359, %v353_v21  }
  0x39   :  { %572 = vperm.xlu0 %1358, %v356_v22  }
  0x3a   :  { %1266 = vmatmul.mubr.bf16.gmra.mrb[12].mxu0 %v1376_v33  ;;  %568 = vperm.xlu1 %1359, %v355_v23  }
  0x3d   :  { %576 = vperm.xlu0 %1358, %v357_v27  }
  0x3e   :  { %1360 = vset.pattern.permute.xlu1 %v1377_v1 }
  0x3f   :  { %393 = vperm.xlu1 %1360, %v343_v30  }
  0x41   :  { %580 = vperm.xlu0 %1358, %v358_v25   ;;  %v360_v25 = vld [vmem:[%s1977_s2 + $0x8] sm:$0xff] }
  0x43   :  { %398 = vperm.xlu1 %1360, %v344_v28  }
  0x83   :  { %v404_v51 = vpop.permute.xlu0 %403 }
  0x84   :  { %v1569_v41 = vpop.permute.xlu1 %413 }
  0x87   :  { %v409_v53 = vpop.permute.xlu0 %408 }
  0x88   :  { %v1571_v42 = vpop.permute.xlu1 %418 }
  0x8b   :  { %v1593_v55 = vpop.permute.xlu0 %423 }
  0x8c   :  { %v1573_v43 = vpop.permute.xlu1 %428 }
  0x8f   :  { %v1597_v59 = vpop.permute.xlu0 %433 }
  0x90   :  { %v1575_v44 = vpop.permute.xlu1 %438 }
  0x93   :  { %v1605_v8 = vpop.permute.xlu0 %443 }
  0x94   :  { %v1577_v45 = vpop.permute.xlu1 %448 }
  0x97   :  { %v1629_v30 = vpop.permute.xlu0 %453 }
  0x98   :  { %v1579_v46 = vpop.permute.xlu1 %458 }
  0x9c   :  { %v1581_v47 = vpop.permute.xlu1 %468 }
  0xa1   :  { %v1583_v48 = vpop.permute.xlu1 %524 }
  0xa5   :  { %v1585_v49 = vpop.permute.xlu1 %528 }
  0xa9   :  { %v1587_v50 = vpop.permute.xlu1 %536 }
  0xad   :  { %v1589_v52 = vpop.permute.xlu1 %544 }
  0xb1   :  { %v1591_v54 = vpop.permute.xlu1 %552 }
  0xb5   :  { %v1595_v56 = vpop.permute.xlu1 %560 }
  0xb9   :  { %v1599_v1 = vpop.permute.xlu1 %568 }
  0xbe   :  { %v394_v10 = vpop.permute.xlu1 %393 }
  0xc2   :  { %v399_v32 = vpop.permute.xlu1 %398 }
  0xf5   :  { %v1255_v60 = vpop.f32.mrb[0].mxu0 }
  0xf6   :  { %v293_v62 = vadd.f32 %v1255_v60, %v52_v57  ;;  %v228_v63 = vpop.f32.mrb[1].mxu0  ;;  %v58_v57 = vld [vmem:[#allocation2 + $0x40] sm:$0xff] }
  0xf7   :  { %v291_v2 = vadd.f32 %v228_v63, %v50_v58  ;;  %v1256_v3 = vpop.f32.mrb[2].mxu0 }
  0xf8   :  { %310 = vst.msk [vmem:[#allocation2 + $0x10] sm:$0xff] %vm33_vm0, %v293_v62  ;;  %v294_v4 = vadd.f32 %v1256_v3, %v53_v61  ;;  %v231_v5 = vpop.f32.mrb[3].mxu0  ;;  %v61_v61 = vld [vmem:[#allocation2 + $0x58] sm:$0xff] }
  0xf9   :  { %308 = vst.msk [vmem:[#allocation2] sm:$0xff] %vm33_vm0, %v291_v2  ;;  %v292_v6 = vadd.f32 %v231_v5, %v51_v0  ;;  %v363_v0 = vld [vmem:[%s1977_s2 + $0x20] sm:$0xff]  ;;  %v1650_v5 = vpop.permute.xlu0 %463 }
  0xfa   :  { %311 = vst.msk [vmem:[#allocation2 + $0x18] sm:$0xff] %vm33_vm0, %v294_v4  ;;  %v365_v4 = vld [vmem:[%s1977_s2 + $0x30] sm:$0xff] }
  0xfb   :  { %309 = vst.msk [vmem:[#allocation2 + $0x8] sm:$0xff] %vm33_vm0, %v292_v6  ;;  %v364_v6 = vld [vmem:[%s1977_s2 + $0x28] sm:$0xff] }
  0xfd   :  { %v1259_v11 = vpop.f32.mrb[4].mxu0 }
  0xfe   :  { %v297_v14 = vadd.f32 %v1259_v11, %v56_v7  ;;  %v244_v15 = vpop.f32.mrb[5].mxu0 }
  0xff   :  { %v295_v18 = vadd.f32 %v244_v15, %v54_v9  ;;  %v1260_v20 = vpop.f32.mrb[6].mxu0  ;;  %v1616_v21 = vld [vmem:[#allocation2 + $0x10] sm:$0xff] }
 0x100   :  { %v1618_v22 = vld [vmem:[#allocation2] sm:$0xff]  ;;  %314 = vst.msk [vmem:[#allocation2 + $0x30] sm:$0xff] %vm33_vm0, %v297_v14  ;;  %v298_v23 = vadd.f32 %v1260_v20, %v57_v12  ;;  %v247_v24 = vpop.f32.mrb[7].mxu0  ;;  %v377_v26 = vadd.f32 %v361_v13, %v1616_v21  ;;  %v366_v14 = vld [vmem:[%s1977_s2 + $0x38] sm:$0xff] }
 0x101   :  { %312 = vst.msk [vmem:[#allocation2 + $0x20] sm:$0xff] %vm33_vm0, %v295_v18  ;;  %v1626_v27 = vld [vmem:[#allocation2 + $0x18] sm:$0xff]  ;;  %v375_v28 = vadd.f32 %v359_v16, %v1618_v22  ;;  %v296_v29 = vadd.f32 %v247_v24, %v55_v17  ;;  %v64_v17 = vld [vmem:[#allocation2 + $0x70] sm:$0xff] }
 0x102   :  { %v378_v31 = vadd.f32 %v362_v19, %v1626_v27  ;;  %315 = vst.msk [vmem:[#allocation2 + $0x38] sm:$0xff] %vm33_vm0, %v298_v23  ;;  %v1633_v33 = vld [vmem:[#allocation2 + $0x8] sm:$0xff]  ;;  %v473_v34 = vmul.f32 %v404_v51, %v377_v26  ;;  %v62_v19 = vld [vmem:[#allocation2 + $0x60] sm:$0xff]  ;;  %v1677_v26 = vpop.permute.xlu0 %520 }
 0x103   :  { %v471_v35 = vmul.f32 %v394_v10, %v375_v28  ;;  %313 = vst.msk [vmem:[#allocation2 + $0x28] sm:$0xff] %vm33_vm0, %v296_v29  ;;  %v376_v36 = vadd.f32 %v360_v25, %v1633_v33  ;;  %v59_v51 = vld [vmem:[#allocation2 + $0x48] sm:$0xff]  ;;  %v65_v25 = vld [vmem:[#allocation2 + $0x78] sm:$0xff] }
 0x104   :  { %v474_v39 = vmul.f32 %v409_v53, %v378_v31  ;;  %1280 = vmatprep.mubr.msk.f32.mxu1 %vm33_vm0, %v473_v34  ;;  %v63_v31 = vld [vmem:[#allocation2 + $0x68] sm:$0xff] }
 0x105   :  { %v472_v58 = vmul.f32 %v399_v32, %v376_v36  ;;  %v1263_v60 = vpop.f32.mrb[8].mxu0  ;;  %1277 = vmatprep.mubr.msk.f32.mxu0 %vm33_vm0, %v471_v35  ;;  %v369_v35 = vld [vmem:[%s1977_s2 + $0x50] sm:$0xff]  ;;  %v368_v36 = vld [vmem:[%s1977_s2 + $0x48] sm:$0xff] }
 0x106   :  { %v301_v62 = vadd.f32 %v1263_v60, %v60_v38  ;;  %v260_v63 = vpop.f32.mrb[9].mxu0  ;;  %1281 = vmatmul.mubr.msk.f32.vlgmr.msra.gmra.mrb[0].mxu1 %vm33_vm0, %v474_v39 }
 0x107   :  { %v299_v2 = vadd.f32 %v260_v63, %v58_v57  ;;  %v1264_v3 = vpop.f32.mrb[10].mxu0  ;;  %1278 = vmatmul.mubr.msk.f32.vlgmr.msra.gmra.mrb[16].mxu0 %vm33_vm0, %v472_v58  ;;  %1344 = vmatpush3.bf16.msra.mxu1 %v1550_v37  ;;  %v1645_v53 = vld [vmem:[#allocation2 + $0x30] sm:$0xff]  ;;  %v370_v63 = vld [vmem:[%s1977_s2 + $0x58] sm:$0xff] }
 0x108   :  { %318 = vst.msk [vmem:[#allocation2 + $0x50] sm:$0xff] %vm33_vm0, %v301_v62  ;;  %v302_v7 = vadd.f32 %v1264_v3, %v61_v61  ;;  %v263_v9 = vpop.f32.mrb[11].mxu0  ;;  %v1656_v10 = vld [vmem:[#allocation2 + $0x20] sm:$0xff]  ;;  %1346 = vmatprep.subr.bf16.mxu1 %v1562_v40  ;;  %v381_v15 = vadd.f32 %v365_v4, %v1645_v53 }
 0x109   :  { %316 = vst.msk [vmem:[#allocation2 + $0x40] sm:$0xff] %vm33_vm0, %v299_v2  ;;  %v300_v37 = vadd.f32 %v263_v9, %v59_v51  ;;  %v379_v11 = vadd.f32 %v363_v0, %v1656_v10  ;;  %v1663_v13 = vld [vmem:[#allocation2 + $0x38] sm:$0xff]  ;;  %v533_v2 = vpop.permute.xlu0 %532 }
 0x10a   :  { %v1661_v12 = vld [vmem:[#allocation2 + $0x28] sm:$0xff]  ;;  %319 = vst.msk [vmem:[#allocation2 + $0x58] sm:$0xff] %vm33_vm0, %v302_v7  ;;  %v382_v23 = vadd.f32 %v366_v14, %v1663_v13  ;;  %v477_v32 = vmul.f32 %v1593_v55, %v381_v15  ;;  %v371_v7 = vld [vmem:[%s1977_s2 + $0x60] sm:$0xff] }
 0x10b   :  { %v380_v16 = vadd.f32 %v364_v6, %v1661_v12  ;;  %317 = vst.msk [vmem:[#allocation2 + $0x48] sm:$0xff] %vm33_vm0, %v300_v37  ;;  %v475_v18 = vmul.f32 %v1569_v41, %v379_v11  ;;  %1348 = vmatpush3.bf16.msra.mxu1 %v1562_v40  ;;  %v367_v40 = vld [vmem:[%s1977_s2 + $0x40] sm:$0xff]  ;;  %v373_v37 = vld [vmem:[%s1977_s2 + $0x70] sm:$0xff] }
 0x10c   :  { %v478_v57 = vmul.f32 %v1573_v43, %v382_v23 }
 0x10d   :  { %v476_v20 = vmul.f32 %v1571_v42, %v380_v16  ;;  %v1267_v24 = vpop.f32.mrb[12].mxu0  ;;  %1283 = vmatprep.mubr.msk.f32.mxu1 %vm33_vm0, %v475_v18  ;;  %v541_v14 = vpop.permute.xlu0 %540  ;;  %v374_v18 = vld [vmem:[%s1977_s2 + $0x78] sm:$0xff] }
 0x10e   :  { %v305_v28 = vadd.f32 %v1267_v24, %v64_v17  ;;  %v276_v29 = vpop.f32.mrb[13].mxu0 }
 0x10f   :  { %v303_v41 = vadd.f32 %v276_v29, %v62_v19  ;;  %v1268_v34 = vpop.f32.mrb[14].mxu0  ;;  %1284 = vmatmul.mubr.msk.f32.gmra.mrb[2].mxu1 %vm33_vm0, %v476_v20  ;;  %v1684_v42 = vld [vmem:[#allocation2 + $0x50] sm:$0xff]  ;;  %v487_v19 = vld [vmem:[%s1978_s3] sm:$0xff] }
 0x110   :  { %322 = vst.msk [vmem:[#allocation2 + $0x70] sm:$0xff] %vm33_vm0, %v305_v28  ;;  %v306_v55 = vadd.f32 %v1268_v34, %v65_v25  ;;  %v279_v38 = vpop.f32.mrb[15].mxu0  ;;  %1286 = vmatprep.mubr.msk.f32.mxu1 %vm33_vm0, %v477_v32  ;;  %v1694_v39 = vld [vmem:[#allocation2 + $0x40] sm:$0xff]  ;;  %v385_v51 = vadd.f32 %v369_v35, %v1684_v42  ;;  %v503_v25 = vadd.f32 %v487_v19, %v1618_v22  ;;  %v488_v28 = vld [vmem:[%s1978_s3 + $0x8] sm:$0xff] }
 0x111   :  { %320 = vst.msk [vmem:[#allocation2 + $0x60] sm:$0xff] %vm33_vm0, %v303_v41  ;;  %v304_v58 = vadd.f32 %v279_v38, %v63_v31  ;;  %v383_v60 = vadd.f32 %v367_v40, %v1694_v39  ;;  %v1701_v62 = vld [vmem:[#allocation2 + $0x58] sm:$0xff]  ;;  %v489_v31 = vld [vmem:[%s1978_s3 + $0x10] sm:$0xff]  ;;  %v491_v41 = vld [vmem:[%s1978_s3 + $0x20] sm:$0xff] }
 0x112   :  { %v1699_v61 = vld [vmem:[#allocation2 + $0x48] sm:$0xff]  ;;  %323 = vst.msk [vmem:[#allocation2 + $0x78] sm:$0xff] %vm33_vm0, %v306_v55  ;;  %v386_v4 = vadd.f32 %v370_v63, %v1701_v62  ;;  %v481_v6 = vmul.f32 %v1605_v8, %v385_v51  ;;  %v583_v22 = vmul.f32 %v1677_v26, %v503_v25  ;;  %v490_v40 = vld [vmem:[%s1978_s3 + $0x18] sm:$0xff]  ;;  %v497_v63 = vld [vmem:[%s1978_s3 + $0x50] sm:$0xff] }
 0x113   :  { %v384_v0 = vadd.f32 %v368_v36, %v1699_v61  ;;  %321 = vst.msk [vmem:[#allocation2 + $0x68] sm:$0xff] %vm33_vm0, %v304_v58  ;;  %1287 = vmatmul.mubr.msk.f32.gmra.mrb[4].mxu1 %vm33_vm0, %v478_v57  ;;  %v479_v43 = vmul.f32 %v1597_v59, %v383_v60  ;;  %v492_v26 = vld [vmem:[%s1978_s3 + $0x28] sm:$0xff]  ;;  %v493_v36 = vld [vmem:[%s1978_s3 + $0x30] sm:$0xff]  ;;  %v494_v55 = vld [vmem:[%s1978_s3 + $0x38] sm:$0xff] }
 0x114   :  { %v482_v8 = vmul.f32 %v1577_v45, %v386_v4  ;;  %v496_v60 = vld [vmem:[%s1978_s3 + $0x48] sm:$0xff] }
 0x115   :  { %v480_v3 = vmul.f32 %v1575_v44, %v384_v0  ;;  %1289 = vmatprep.mubr.msk.f32.mxu1 %vm33_vm0, %v479_v43  ;;  %v372_v44 = vld [vmem:[%s1977_s2 + $0x68] sm:$0xff]  ;;  %v512_v0 = vadd.f32 %v496_v60, %v1699_v61 }
 0x116   :  { %v500_v4 = vld [vmem:[%s1978_s3 + $0x68] sm:$0xff] }
 0x117   :  { %v1719_v9 = vld [vmem:[#allocation2 + $0x70] sm:$0xff]  ;;  %1290 = vmatmul.mubr.msk.f32.gmra.mrb[6].mxu1 %vm33_vm0, %v480_v3 }
 0x118   :  { %1292 = vmatprep.mubr.msk.f32.mxu1 %vm33_vm0, %v481_v6  ;;  %v1729_v59 = vld [vmem:[#allocation2 + $0x60] sm:$0xff]  ;;  %v389_v16 = vadd.f32 %v373_v37, %v1719_v9 }
 0x119   :  { %v387_v11 = vadd.f32 %v371_v7, %v1729_v59  ;;  %v1736_v17 = vld [vmem:[#allocation2 + $0x78] sm:$0xff] }
 0x11a   :  { %v1733_v15 = vld [vmem:[#allocation2 + $0x68] sm:$0xff]  ;;  %v390_v24 = vadd.f32 %v374_v18, %v1736_v17  ;;  %v485_v29 = vmul.f32 %v1650_v5, %v389_v16  ;;  %v505_v5 = vadd.f32 %v489_v31, %v1616_v21  ;;  %v507_v21 = vadd.f32 %v491_v41, %v1656_v10  ;;  %v495_v10 = vld [vmem:[%s1978_s3 + $0x40] sm:$0xff] }
 0x11b   :  { %v388_v20 = vadd.f32 %v372_v44, %v1733_v15  ;;  %1293 = vmatmul.mubr.msk.f32.gmra.mrb[8].mxu1 %vm33_vm0, %v482_v8  ;;  %v483_v45 = vmul.f32 %v1629_v30, %v387_v11  ;;  %v549_v30 = vpop.permute.xlu0 %548 }
 0x11c   :  { %v486_v32 = vmul.f32 %v1581_v47, %v390_v24  ;;  %v585_v35 = vmul.f32 %v1585_v49, %v505_v5  ;;  %v587_v38 = vmul.f32 %v1587_v50, %v507_v21  ;;  %v509_v49 = vadd.f32 %v493_v36, %v1645_v53 }
 0x11d   :  { %v484_v23 = vmul.f32 %v1579_v46, %v388_v20  ;;  %1295 = vmatprep.mubr.msk.f32.mxu1 %vm33_vm0, %v483_v45  ;;  %v504_v46 = vadd.f32 %v488_v28, %v1633_v33  ;;  %v506_v33 = vadd.f32 %v490_v40, %v1626_v27  ;;  %v511_v53 = vadd.f32 %v495_v10, %v1694_v39 }
 0x11e   :  { %v589_v50 = vmul.f32 %v1589_v52, %v509_v49  ;;  %v513_v39 = vadd.f32 %v497_v63, %v1684_v42  ;;  %v501_v42 = vld [vmem:[%s1978_s3 + $0x70] sm:$0xff] }
 0x11f   :  { %1296 = vmatmul.mubr.msk.f32.gmra.mrb[10].mxu1 %vm33_vm0, %v484_v23  ;;  %v584_v47 = vmul.f32 %v1583_v48, %v504_v46  ;;  %v557_v34 = vpop.permute.xlu0 %556  ;;  %v586_v27 = vmul.f32 %v533_v2, %v506_v33  ;;  %v508_v48 = vadd.f32 %v492_v26, %v1661_v12  ;;  %v510_v12 = vadd.f32 %v494_v55, %v1663_v13  ;;  %v498_v13 = vld [vmem:[%s1978_s3 + $0x58] sm:$0xff]  ;;  %v499_v2 = vld [vmem:[%s1978_s3 + $0x60] sm:$0xff] }
 0x120   :  { %1298 = vmatprep.mubr.msk.f32.mxu1 %vm33_vm0, %v485_v29  ;;  %v591_v52 = vmul.f32 %v1591_v54, %v511_v53  ;;  %v592_v3 = vmul.f32 %v557_v34, %v512_v0  ;;  %v514_v61 = vadd.f32 %v498_v13, %v1701_v62  ;;  %v593_v6 = vmul.f32 %v1595_v56, %v513_v39  ;;  %v502_v56 = vld [vmem:[%s1978_s3 + $0x78] sm:$0xff] }
 0x121   :  { %v588_v58 = vmul.f32 %v541_v14, %v508_v48  ;;  %v590_v51 = vmul.f32 %v549_v30, %v510_v12  ;;  %v515_v54 = vadd.f32 %v499_v2, %v1729_v59  ;;  %v516_v62 = vadd.f32 %v500_v4, %v1733_v15 }
 0x122   :  { %v517_v44 = vadd.f32 %v501_v42, %v1719_v9  ;;  %v518_v11 = vadd.f32 %v502_v56, %v1736_v17 }
 0x123   :  { %1299 = vmatmul.mubr.msk.f32.gmra.mrb[12].mxu1 %vm33_vm0, %v486_v32  ;;  %v565_v57 = vpop.permute.xlu0 %564  ;;  %v595_v59 = vmul.f32 %v1599_v1, %v515_v54  ;;  %v1843_v1 = vld [vmem:[%s1979_s6] ss:$0 sm:$0xff] }
 0x124   :  { %1309 = vmatprep.mubr.msk.f32.mxu1 %vm33_vm0, %v583_v22  ;;  %v594_v37 = vmul.f32 %v565_v57, %v514_v61 }
 0x127   :  { %1310 = vmatmul.mubr.msk.f32.vlgmr.msra.gmra.mrb[14].mxu1 %vm33_vm0, %v584_v47  ;;  %v573_v43 = vpop.permute.xlu0 %572 }
 0x128   :  { %1312 = vmatprep.mubr.msk.f32.mxu1 %vm33_vm0, %v585_v35  ;;  %v596_v8 = vmul.f32 %v573_v43, %v516_v62 }
 0x12b   :  { %1313 = vmatmul.mubr.msk.f32.gmra.mrb[16].mxu1 %vm33_vm0, %v586_v27  ;;  %v577_v7 = vpop.permute.xlu0 %576 }
 0x12c   :  { %1315 = vmatprep.mubr.msk.f32.mxu1 %vm33_vm0, %v587_v38  ;;  %v597_v14 = vmul.f32 %v577_v7, %v517_v44 }
 0x12f   :  { %1316 = vmatmul.mubr.msk.f32.gmra.mrb[18].mxu1 %vm33_vm0, %v588_v58  ;;  %v581_v16 = vpop.permute.xlu0 %580 }
 0x130   :  { %1318 = vmatprep.mubr.msk.f32.mxu1 %vm33_vm0, %v589_v50  ;;  %v598_v9 = vmul.f32 %v581_v16, %v518_v11 }
 0x133   :  { %1319 = vmatmul.mubr.msk.f32.gmra.mrb[20].mxu1 %vm33_vm0, %v590_v51 }
 0x134   :  { %1321 = vmatprep.mubr.msk.f32.mxu1 %vm33_vm0, %v591_v52 }
 0x137   :  { %1322 = vmatmul.mubr.msk.f32.gmra.mrb[22].mxu1 %vm33_vm0, %v592_v3 }
 0x138   :  { %1324 = vmatprep.mubr.msk.f32.mxu1 %vm33_vm0, %v593_v6 }
 0x13b   :  { %1325 = vmatmul.mubr.msk.f32.gmra.mrb[24].mxu1 %vm33_vm0, %v594_v37 }
 0x13c   :  { %1327 = vmatprep.mubr.msk.f32.mxu1 %vm33_vm0, %v595_v59 }
 0x13f   :  { %1328 = vmatmul.mubr.msk.f32.gmra.mrb[26].mxu1 %vm33_vm0, %v596_v8 }
 0x140   :  { %1330 = vmatprep.mubr.msk.f32.mxu1 %vm33_vm0, %v597_v14 }
 0x143   :  { %1331 = vmatmul.mubr.msk.f32.gmra.mrb[28].mxu1 %vm33_vm0, %v598_v9 }
 0x1d9   :  { %v1282_v15 = vpop.f32.mrb[0].mxu1 }
 0x1da   :  { %v740_v18 = vadd.f32 %v1282_v15, %v1843_v1  ;;  %v1279_v19 = vpop.f32.mrb[16].mxu0  ;;  %v734_v20 = vpop.f32.mrb[1].mxu1 }
 0x1db   :  { %v730_v17 = vadd.f32 %v1279_v19, %v1843_v1  ;;  %v735_v45 = vadd.f32 %v1843_v1, %v734_v20  ;;  %v724_v23 = vpop.f32.mrb[17].mxu0 }
 0x1dc   :  { %vm999_vm1 = vcmp.gt.f32.partialorder %v740_v18, 0.0  ;;  %v1015_v24 = vmul.f32 0.01, %v740_v18  ;;  %v725_v25 = vadd.f32 %v1843_v1, %v724_v23 }
 0x1dd   :  { %vm997_vm2 = vcmp.gt.f32.partialorder %v730_v17, 0.0  ;;  %v1013_v28 = vmul.f32 0.01, %v730_v17  ;;  %vm998_vm3 = vcmp.gt.f32.partialorder %v735_v45, 0.0  ;;  %v1014_v29 = vmul.f32 0.01, %v735_v45 }
 0x1de   :  { %v1031_v31 = vsel %vm999_vm1, %v740_v18, %v1015_v24  ;;  %vm996_vm4 = vcmp.gt.f32.partialorder %v725_v25, 0.0  ;;  %v1012_v30 = vmul.f32 0.01, %v725_v25 }
 0x1df   :  { %1047 = vst [vmem:[%s1980_s7 + $0x18] sm:$0xff] %v1031_v31  ;;  %v1029_v46 = vsel %vm997_vm2, %v730_v17, %v1013_v28  ;;  %v1030_v32 = vsel %vm998_vm3, %v735_v45, %v1014_v29 }
 0x1e0   :  { %1045 = vst [vmem:[%s1980_s7 + $0x8] sm:$0xff] %v1029_v46  ;;  %1046 = vst [vmem:[%s1980_s7 + $0x10] sm:$0xff] %v1030_v32  ;;  %v1028_v22 = vsel %vm996_vm4, %v725_v25, %v1012_v30 }
 0x1e1   :  { %1044 = vst [vmem:[%s1980_s7] sm:$0xff] %v1028_v22 }
 0x1e2   :  { %v1285_v40 = vpop.f32.mrb[2].mxu1 }
 0x1e3   :  { %v750_v5 = vadd.f32 %v1285_v40, %v1843_v1  ;;  %v744_v41 = vpop.f32.mrb[3].mxu1 }
 0x1e4   :  { %v745_v33 = vadd.f32 %v1843_v1, %v744_v41 }
 0x1e5   :  { %vm1001_vm5 = vcmp.gt.f32.partialorder %v750_v5, 0.0  ;;  %v1017_v47 = vmul.f32 0.01, %v750_v5 }
 0x1e6   :  { %vm1000_vm6 = vcmp.gt.f32.partialorder %v745_v33, 0.0  ;;  %v1016_v26 = vmul.f32 0.01, %v745_v33  ;;  %v1288_v34 = vpop.f32.mrb[4].mxu1 }
 0x1e7   :  { %v1033_v35 = vsel %vm1001_vm5, %v750_v5, %v1017_v47  ;;  %v760_v21 = vadd.f32 %v1288_v34, %v1843_v1  ;;  %v754_v36 = vpop.f32.mrb[5].mxu1 }
 0x1e8   :  { %1049 = vst [vmem:[%s1980_s7 + $0x28] sm:$0xff] %v1033_v35  ;;  %v1032_v27 = vsel %vm1000_vm6, %v745_v33, %v1016_v26  ;;  %v755_v48 = vadd.f32 %v1843_v1, %v754_v36 }
 0x1e9   :  { %1048 = vst [vmem:[%s1980_s7 + $0x20] sm:$0xff] %v1032_v27  ;;  %vm1003_vm7 = vcmp.gt.f32.partialorder %v760_v21, 0.0  ;;  %v1019_v55 = vmul.f32 0.01, %v760_v21 }
 0x1ea   :  { %vm1002_vm8 = vcmp.gt.f32.partialorder %v755_v48, 0.0  ;;  %v1018_v38 = vmul.f32 0.01, %v755_v48  ;;  %v1291_v49 = vpop.f32.mrb[6].mxu1 }
 0x1eb   :  { %v1035_v10 = vsel %vm1003_vm7, %v760_v21, %v1019_v55  ;;  %v770_v57 = vadd.f32 %v1291_v49, %v1843_v1  ;;  %v764_v58 = vpop.f32.mrb[7].mxu1 }
 0x1ec   :  { %1051 = vst [vmem:[%s1980_s7 + $0x38] sm:$0xff] %v1035_v10  ;;  %v1034_v12 = vsel %vm1002_vm8, %v755_v48, %v1018_v38  ;;  %v765_v60 = vadd.f32 %v1843_v1, %v764_v58 }
 0x1ed   :  { %1050 = vst [vmem:[%s1980_s7 + $0x30] sm:$0xff] %v1034_v12  ;;  %vm1005_vm9 = vcmp.gt.f32.partialorder %v770_v57, 0.0  ;;  %v1021_v50 = vmul.f32 0.01, %v770_v57 }
 0x1ee   :  { %vm1004_vm10 = vcmp.gt.f32.partialorder %v765_v60, 0.0  ;;  %v1020_v53 = vmul.f32 0.01, %v765_v60  ;;  %v1294_v63 = vpop.f32.mrb[8].mxu1 }
 0x1ef   :  { %v1037_v51 = vsel %vm1005_vm9, %v770_v57, %v1021_v50  ;;  %v780_v0 = vadd.f32 %v1294_v63, %v1843_v1  ;;  %v774_v13 = vpop.f32.mrb[9].mxu1 }
 0x1f0   :  { %1053 = vst [vmem:[%s1980_s7 + $0x48] sm:$0xff] %v1037_v51  ;;  %v1036_v43 = vsel %vm1004_vm10, %v765_v60, %v1020_v53  ;;  %v775_v52 = vadd.f32 %v1843_v1, %v774_v13 }
 0x1f1   :  { %1052 = vst [vmem:[%s1980_s7 + $0x40] sm:$0xff] %v1036_v43  ;;  %vm1007_vm11 = vcmp.gt.f32.partialorder %v780_v0, 0.0  ;;  %v1023_v39 = vmul.f32 0.01, %v780_v0 }
 0x1f2   :  { %vm1006_vm12 = vcmp.gt.f32.partialorder %v775_v52, 0.0  ;;  %v1022_v2 = vmul.f32 0.01, %v775_v52  ;;  %v1297_v3 = vpop.f32.mrb[10].mxu1 }
 0x1f3   :  { %v1039_v61 = vsel %vm1007_vm11, %v780_v0, %v1023_v39  ;;  %v790_v4 = vadd.f32 %v1297_v3, %v1843_v1  ;;  %v784_v6 = vpop.f32.mrb[11].mxu1 }
 0x1f4   :  { %1055 = vst [vmem:[%s1980_s7 + $0x58] sm:$0xff] %v1039_v61  ;;  %v1038_v54 = vsel %vm1006_vm12, %v775_v52, %v1022_v2  ;;  %v785_v42 = vadd.f32 %v1843_v1, %v784_v6 }
 0x1f5   :  { %1054 = vst [vmem:[%s1980_s7 + $0x50] sm:$0xff] %v1038_v54  ;;  %vm1009_vm13 = vcmp.gt.f32.partialorder %v790_v4, 0.0  ;;  %v1025_v7 = vmul.f32 0.01, %v790_v4 }
 0x1f6   :  { %vm1008_vm14 = vcmp.gt.f32.partialorder %v785_v42, 0.0  ;;  %v1024_v37 = vmul.f32 0.01, %v785_v42  ;;  %v1300_v62 = vpop.f32.mrb[12].mxu1 }
 0x1f7   :  { %v1041_v44 = vsel %vm1009_vm13, %v790_v4, %v1025_v7  ;;  %v800_v56 = vadd.f32 %v1300_v62, %v1843_v1  ;;  %v794_v59 = vpop.f32.mrb[13].mxu1 }
 0x1f8   :  { %1057 = vst [vmem:[%s1980_s7 + $0x68] sm:$0xff] %v1041_v44  ;;  %v1040_v8 = vsel %vm1008_vm14, %v785_v42, %v1024_v37  ;;  %v795_v11 = vadd.f32 %v1843_v1, %v794_v59 }
 0x1f9   :  { %1056 = vst [vmem:[%s1980_s7 + $0x60] sm:$0xff] %v1040_v8  ;;  %vm1011_vm15 = vcmp.gt.f32.partialorder %v800_v56, 0.0  ;;  %v1027_v14 = vmul.f32 0.01, %v800_v56 }
 0x1fa   :  { %vm1010_vm0 = vcmp.gt.f32.partialorder %v795_v11, 0.0  ;;  %v1026_v16 = vmul.f32 0.01, %v795_v11  ;;  %v1311_v9 = vpop.f32.mrb[14].mxu1 }
 0x1fb   :  { %v1043_v15 = vsel %vm1011_vm15, %v800_v56, %v1027_v14  ;;  %v923_v18 = vadd.f32 %v1311_v9, %v1843_v1  ;;  %v917_v19 = vpop.f32.mrb[15].mxu1 }
 0x1fc   :  { %1059 = vst [vmem:[%s1980_s7 + $0x78] sm:$0xff] %v1043_v15  ;;  %v1042_v20 = vsel %vm1010_vm0, %v795_v11, %v1026_v16  ;;  %v918_v17 = vadd.f32 %v1843_v1, %v917_v19 }
 0x1fd   :  { %1058 = vst [vmem:[%s1980_s7 + $0x70] sm:$0xff] %v1042_v20  ;;  %vm1061_vm1 = vcmp.gt.f32.partialorder %v923_v18, 0.0  ;;  %v1077_v45 = vmul.f32 0.01, %v923_v18 }
 0x1fe   :  { %vm1060_vm2 = vcmp.gt.f32.partialorder %v918_v17, 0.0  ;;  %v1076_v23 = vmul.f32 0.01, %v918_v17  ;;  %v1314_v24 = vpop.f32.mrb[16].mxu1 }
 0x1ff   :  { %v1093_v25 = vsel %vm1061_vm1, %v923_v18, %v1077_v45  ;;  %v933_v28 = vadd.f32 %v1314_v24, %v1843_v1  ;;  %v927_v29 = vpop.f32.mrb[17].mxu1 }
 0x200   :  { %1109 = vst [vmem:[%s1981_s8 + $0x8] sm:$0xff] %v1093_v25  ;;  %v1092_v31 = vsel %vm1060_vm2, %v918_v17, %v1076_v23  ;;  %v928_v30 = vadd.f32 %v1843_v1, %v927_v29 }
 0x201   :  { %1108 = vst [vmem:[%s1981_s8] sm:$0xff] %v1092_v31  ;;  %vm1063_vm3 = vcmp.gt.f32.partialorder %v933_v28, 0.0  ;;  %v1079_v46 = vmul.f32 0.01, %v933_v28 }
 0x202   :  { %vm1062_vm4 = vcmp.gt.f32.partialorder %v928_v30, 0.0  ;;  %v1078_v32 = vmul.f32 0.01, %v928_v30  ;;  %v1317_v22 = vpop.f32.mrb[18].mxu1 }
 0x203   :  { %v1095_v40 = vsel %vm1063_vm3, %v933_v28, %v1079_v46  ;;  %v943_v5 = vadd.f32 %v1317_v22, %v1843_v1  ;;  %v937_v41 = vpop.f32.mrb[19].mxu1 }
 0x204   :  { %1111 = vst [vmem:[%s1981_s8 + $0x18] sm:$0xff] %v1095_v40  ;;  %v1094_v33 = vsel %vm1062_vm4, %v928_v30, %v1078_v32  ;;  %v938_v47 = vadd.f32 %v1843_v1, %v937_v41 }
 0x205   :  { %1110 = vst [vmem:[%s1981_s8 + $0x10] sm:$0xff] %v1094_v33  ;;  %vm1065_vm5 = vcmp.gt.f32.partialorder %v943_v5, 0.0  ;;  %v1081_v26 = vmul.f32 0.01, %v943_v5 }
 0x206   :  { %vm1064_vm6 = vcmp.gt.f32.partialorder %v938_v47, 0.0  ;;  %v1080_v34 = vmul.f32 0.01, %v938_v47  ;;  %v1320_v35 = vpop.f32.mrb[20].mxu1 }
 0x207   :  { %v1097_v21 = vsel %vm1065_vm5, %v943_v5, %v1081_v26  ;;  %v953_v36 = vadd.f32 %v1320_v35, %v1843_v1  ;;  %v947_v27 = vpop.f32.mrb[21].mxu1 }
 0x208   :  { %1113 = vst [vmem:[%s1981_s8 + $0x28] sm:$0xff] %v1097_v21  ;;  %v1096_v48 = vsel %vm1064_vm6, %v938_v47, %v1080_v34  ;;  %v948_v55 = vadd.f32 %v1843_v1, %v947_v27 }
 0x209   :  { %1112 = vst [vmem:[%s1981_s8 + $0x20] sm:$0xff] %v1096_v48  ;;  %vm1067_vm7 = vcmp.gt.f32.partialorder %v953_v36, 0.0  ;;  %v1083_v38 = vmul.f32 0.01, %v953_v36 }
 0x20a   :  { %vm1066_vm8 = vcmp.gt.f32.partialorder %v948_v55, 0.0  ;;  %v1082_v49 = vmul.f32 0.01, %v948_v55  ;;  %v1323_v10 = vpop.f32.mrb[22].mxu1 }
 0x20b   :  { %v1099_v57 = vsel %vm1067_vm7, %v953_v36, %v1083_v38  ;;  %v963_v58 = vadd.f32 %v1323_v10, %v1843_v1  ;;  %v957_v12 = vpop.f32.mrb[23].mxu1 }
 0x20c   :  { %1115 = vst [vmem:[%s1981_s8 + $0x38] sm:$0xff] %v1099_v57  ;;  %v1098_v60 = vsel %vm1066_vm8, %v948_v55, %v1082_v49  ;;  %v958_v50 = vadd.f32 %v1843_v1, %v957_v12 }
 0x20d   :  { %1114 = vst [vmem:[%s1981_s8 + $0x30] sm:$0xff] %v1098_v60  ;;  %vm1069_vm9 = vcmp.gt.f32.partialorder %v963_v58, 0.0  ;;  %v1085_v53 = vmul.f32 0.01, %v963_v58 }
 0x20e   :  { %vm1068_vm10 = vcmp.gt.f32.partialorder %v958_v50, 0.0  ;;  %v1084_v63 = vmul.f32 0.01, %v958_v50  ;;  %v1326_v51 = vpop.f32.mrb[24].mxu1 }
 0x20f   :  { %v1101_v0 = vsel %vm1069_vm9, %v963_v58, %v1085_v53  ;;  %v973_v13 = vadd.f32 %v1326_v51, %v1843_v1  ;;  %v967_v43 = vpop.f32.mrb[25].mxu1 }
 0x210   :  { %1117 = vst [vmem:[%s1981_s8 + $0x48] sm:$0xff] %v1101_v0  ;;  %v1100_v52 = vsel %vm1068_vm10, %v958_v50, %v1084_v63  ;;  %v968_v39 = vadd.f32 %v1843_v1, %v967_v43 }
 0x211   :  { %1116 = vst [vmem:[%s1981_s8 + $0x40] sm:$0xff] %v1100_v52  ;;  %vm1071_vm11 = vcmp.gt.f32.partialorder %v973_v13, 0.0  ;;  %v1087_v2 = vmul.f32 0.01, %v973_v13 }
 0x212   :  { %vm1070_vm12 = vcmp.gt.f32.partialorder %v968_v39, 0.0  ;;  %v1086_v3 = vmul.f32 0.01, %v968_v39  ;;  %v1329_v61 = vpop.f32.mrb[26].mxu1 }
 0x213   :  { %v1103_v4 = vsel %vm1071_vm11, %v973_v13, %v1087_v2  ;;  %v983_v6 = vadd.f32 %v1329_v61, %v1843_v1  ;;  %v977_v54 = vpop.f32.mrb[27].mxu1 }
 0x214   :  { %1119 = vst [vmem:[%s1981_s8 + $0x58] sm:$0xff] %v1103_v4  ;;  %v1102_v42 = vsel %vm1070_vm12, %v968_v39, %v1086_v3  ;;  %v978_v7 = vadd.f32 %v1843_v1, %v977_v54 }
 0x215   :  { %1118 = vst [vmem:[%s1981_s8 + $0x50] sm:$0xff] %v1102_v42  ;;  %vm1073_vm13 = vcmp.gt.f32.partialorder %v983_v6, 0.0  ;;  %v1089_v37 = vmul.f32 0.01, %v983_v6 }
 0x216   :  { %vm1072_vm14 = vcmp.gt.f32.partialorder %v978_v7, 0.0  ;;  %v1088_v62 = vmul.f32 0.01, %v978_v7  ;;  %v1332_v44 = vpop.f32.mrb[28].mxu1 }
 0x217   :  { %v1105_v56 = vsel %vm1073_vm13, %v983_v6, %v1089_v37  ;;  %v993_v59 = vadd.f32 %v1332_v44, %v1843_v1  ;;  %v987_v8 = vpop.f32.mrb[29].mxu1 }
 0x218   :  { %1121 = vst [vmem:[%s1981_s8 + $0x68] sm:$0xff] %v1105_v56  ;;  %v1104_v11 = vsel %vm1072_vm14, %v978_v7, %v1088_v62  ;;  %v988_v14 = vadd.f32 %v1843_v1, %v987_v8 }
 0x219   :  { %1120 = vst [vmem:[%s1981_s8 + $0x60] sm:$0xff] %v1104_v11  ;;  %vm1075_vm15 = vcmp.gt.f32.partialorder %v993_v59, 0.0  ;;  %v1091_v16 = vmul.f32 0.01, %v993_v59 }
 0x21a   :  { %vm1074_vm0 = vcmp.gt.f32.partialorder %v988_v14, 0.0  ;;  %v1090_v9 = vmul.f32 0.01, %v988_v14 }
 0x21b   :  { %v1107_v15 = vsel %vm1075_vm15, %v993_v59, %v1091_v16 }
 0x21c   :  { %1123 = vst [vmem:[%s1981_s8 + $0x78] sm:$0xff] %v1107_v15  ;;  %v1106_v18 = vsel %vm1074_vm0, %v988_v14, %v1090_v9 }
 0x21d   :  { %1122 = vst [vmem:[%s1981_s8 + $0x70] sm:$0xff] %v1106_v18 }

</bundles_post_ra>
